<compile_context>
chip_gen: v7x
topology: tpu7x:2x2x1
jax: 0.10.0
libtpu: 0.0.40
codegen_flags: <defaults>
</compile_context>

<pallas_src>
import functools

import jax
import jax.numpy as jnp
from jax.experimental import pallas as pl
from jax.experimental.pallas import tpu as pltpu

_LANE = 128
_SUBLANE = 8


def _cox_loss_kernel(scores_ref, status_ref, out_ref, *, n):
    """Cox loss on (R, 128) time-sorted, padded data (row-major order).

    n : number of real (un-padded) samples (static Python int).
    """
    R, L = scores_ref.shape
    s = scores_ref[...]                       # (R, L) f32, sorted by desc. time
    st = status_ref[...]                      # (R, L) f32

    row = jax.lax.broadcasted_iota(jnp.int32, (R, L), 0)
    lane = jax.lax.broadcasted_iota(jnp.int32, (R, L), 1)
    valid = (row * L + lane) < n

    # Numerical stabilization: subtract max over the *valid* elements
    # (matches torch.max over the batch).
    neg_big = jnp.float32(-3.4e38)
    m = jnp.max(jnp.where(valid, s, neg_big), axis=(0, 1), keepdims=True)
    s = jnp.where(valid, s - m, 0.0)

    # exp, with padded elements forced to 0 so they never enter the risk set.
    e = jnp.where(valid, jnp.exp(s), 0.0)

    # ---- Level 1: inclusive cumsum within each 128-lane row, on the MXU ----
    # U[k, j] = 1 if k <= j  =>  (e @ U)[r, j] = sum_{k <= j} e[r, k]
    k_i = jax.lax.broadcasted_iota(jnp.int32, (L, L), 0)
    j_i = jax.lax.broadcasted_iota(jnp.int32, (L, L), 1)
    tri_upper = (k_i <= j_i).astype(jnp.float32)
    row_cumsum = jnp.dot(e, tri_upper, preferred_element_type=jnp.float32)

    # ---- Level 2: carry = exclusive prefix over per-row totals ----
    # tot[r] = sum_k e[r, k]; carry[r] = sum_{r' < r} tot[r'] via a strictly
    # lower-triangular (R, R) matmul against the lane-broadcast totals.
    tot = jnp.broadcast_to(jnp.sum(e, axis=1, keepdims=True), (R, L))
    r_i = jax.lax.broadcasted_iota(jnp.int32, (R, R), 0)
    c_i = jax.lax.broadcasted_iota(jnp.int32, (R, R), 1)
    tri_strict_lower = (c_i < r_i).astype(jnp.float32)
    carry = jnp.dot(tri_strict_lower, tot, preferred_element_type=jnp.float32)

    cumsum = row_cumsum + carry               # full inclusive prefix sum

    loss = s - jnp.log(cumsum + 1e-5)
    loss = jnp.where(valid, -loss * st, 0.0)

    # Mean over the real batch (torch: loss.mean() over B elements).
    out_ref[...] = jnp.sum(loss, axis=(0, 1), keepdims=True) * jnp.float32(1.0 / n)


def cox_loss_pallas(cox_scores, times, status):
    """Pallas implementation of cox_loss.

    Args:
      cox_scores: (B,) f32
      times:      (B,) f32 (event or censor times)
      status:     (B,) f32 (1 = event, 0 = censored)
    Returns:
      scalar f32 loss
    """
    B = cox_scores.shape[0]
    rows = pl.cdiv(B, _LANE)
    R = max(_SUBLANE, ((rows + _SUBLANE - 1) // _SUBLANE) * _SUBLANE)
    Bp = R * _LANE

    s = cox_scores.astype(jnp.float32)
    st = status.astype(jnp.float32)
    t = times.astype(jnp.float32)

    # Single key/value sort by descending time (replaces argsort + 2 gathers).
    # NOTE: lax.sort(is_stable=True) is stable while torch.sort is not --
    # results can differ only when `times` contains exact ties.
    _, s_sorted, st_sorted = jax.lax.sort((-t, s, st), num_keys=1, is_stable=True)

    pad = Bp - B
    s2d = jnp.pad(s_sorted, (0, pad)).reshape(R, _LANE)
    st2d = jnp.pad(st_sorted, (0, pad)).reshape(R, _LANE)

    # VMEM budget: ~a dozen live f32 temporaries of length Bp + the 64 KiB
    # triangular constant.  >= 16 MiB (v5e default), capped at v7x's 64 MiB.
    vmem_limit = int(min(64 * 2**20,
                         max(16 * 2**20, 16 * Bp * 4 + _LANE * _LANE * 4 + (1 << 20))))

    cost = pl.CostEstimate(
        flops=2 * R * _LANE * _LANE + 2 * R * R * _LANE + 10 * Bp,
        transcendentals=2 * Bp,
        bytes_accessed=2 * Bp * 4 + 4,
    )

    out = pl.pallas_call(
        functools.partial(_cox_loss_kernel, n=B),
        out_shape=jax.ShapeDtypeStruct((1, 1), jnp.float32),
        in_specs=[
            pl.BlockSpec((R, _LANE), lambda: (0, 0)),
            pl.BlockSpec((R, _LANE), lambda: (0, 0)),
        ],
        out_specs=pl.BlockSpec((1, 1), lambda: (0, 0)),
        compiler_params=pltpu.CompilerParams(vmem_limit_bytes=vmem_limit),
        cost_estimate=cost,
    )(s2d, st2d)
    return out[0, 0]


def _cox_loss_ref(cox_scores, times, status):
    # Pure-JAX reference (mirrors the PyTorch code) for a sanity check.
    order = jnp.argsort(-times)
    s = cox_scores[order]
    st = status[order]
    s = s - jnp.max(s)
    e = jnp.exp(s)
    loss = s - jnp.log(jnp.cumsum(e) + 1e-5)
    loss = -loss * st
    return jnp.mean(loss)


if __name__ == "__main__":
    key = jax.random.PRNGKey(0)
    fn = jax.jit(cox_loss_pallas)

    # B=8 exercises a single-row batch; B=300 exercises the cross-row carry
    # path (multiple 128-lane rows + padding interacting with the carry).
    for B in (8, 300):
        k1, k2, k3 = jax.random.split(jax.random.fold_in(key, B), 3)
        cox_scores = jax.random.normal(k1, (B,), dtype=jnp.float32)
        times = jax.random.uniform(k2, (B,), dtype=jnp.float32,
                                   minval=0.1, maxval=10.0)
        status = (jax.random.uniform(k3, (B,)) > 0.4).astype(jnp.float32)

        out = jax.block_until_ready(fn(cox_scores, times, status))
        ref = jax.block_until_ready(_cox_loss_ref(cox_scores, times, status))
        assert jnp.allclose(out, ref, atol=1e-4, rtol=1e-4), (B, out, ref)

    print("KERNEL_OK")
</pallas_src>

<mosaic_0001>
module attributes {stable_mosaic.version = 11 : i64} {
  func.func @_cox_loss_kernel(%arg0: memref<8x128xf32, #tpu.memory_space<vmem>>, %arg1: memref<8x128xf32, #tpu.memory_space<vmem>>, %arg2: memref<1x1xf32, #tpu.memory_space<vmem>>) attributes {dimension_semantics = [], scalar_prefetch = 0 : i64, scratch_operands = 0 : i64, tpu.core_type = #tpu.core_type<tc>} {
    %c0 = arith.constant 0 : index
    %c0_0 = arith.constant 0 : index
    %0 = vector.load %arg0[%c0, %c0_0] : memref<8x128xf32, #tpu.memory_space<vmem>>, vector<8x128xf32>
    %c0_1 = arith.constant 0 : index
    %c0_2 = arith.constant 0 : index
    %1 = vector.load %arg1[%c0_1, %c0_2] : memref<8x128xf32, #tpu.memory_space<vmem>>, vector<8x128xf32>
    %2 = tpu.iota {dimensions = array<i32: 0>} : vector<8x128xi32>
    %3 = tpu.iota {dimensions = array<i32: 1>} : vector<8x128xi32>
    %c128_i32 = arith.constant 128 : i32
    %4 = vector.broadcast %c128_i32 : i32 to vector<8x128xi32>
    %5 = arith.muli %2, %4 : vector<8x128xi32>
    %6 = arith.addi %5, %3 : vector<8x128xi32>
    %c8_i32 = arith.constant 8 : i32
    %7 = vector.broadcast %c8_i32 : i32 to vector<8x128xi32>
    %8 = arith.cmpi slt, %6, %7 : vector<8x128xi32>
    %cst = arith.constant -3.400000e+38 : f32
    %9 = vector.broadcast %cst : f32 to vector<8x128xf32>
    %10 = arith.select %8, %0, %9 : vector<8x128xi1>, vector<8x128xf32>
    %11 = vector.shape_cast %10 : vector<8x128xf32> to vector<1x8x128xf32>
    %cst_3 = arith.constant dense<0xFF800000> : vector<1xf32>
    %12 = vector.multi_reduction <maximumf>, %11, %cst_3 [1, 2] : vector<1x8x128xf32> to vector<1xf32>
    %13 = vector.shape_cast %12 : vector<1xf32> to vector<1x1x1xf32>
    %14 = vector.extract %13[0, 0, 0] : f32 from vector<1x1x1xf32>
    %15 = vector.broadcast %14 : f32 to vector<1x1xf32>
    %16 = vector.broadcast %15 : vector<1x1xf32> to vector<8x128xf32>
    %17 = arith.subf %0, %16 : vector<8x128xf32>
    %cst_4 = arith.constant 0.000000e+00 : f32
    %18 = vector.broadcast %cst_4 : f32 to vector<8x128xf32>
    %19 = arith.select %8, %17, %18 : vector<8x128xi1>, vector<8x128xf32>
    %20 = math.exp %19 : vector<8x128xf32>
    %cst_5 = arith.constant 0.000000e+00 : f32
    %21 = vector.broadcast %cst_5 : f32 to vector<8x128xf32>
    %22 = arith.select %8, %20, %21 : vector<8x128xi1>, vector<8x128xf32>
    %23 = tpu.iota {dimensions = array<i32: 0>} : vector<128x128xi32>
    %24 = tpu.iota {dimensions = array<i32: 1>} : vector<128x128xi32>
    %25 = arith.cmpi sle, %23, %24 : vector<128x128xi32>
    %26 = arith.extui %25 : vector<128x128xi1> to vector<128x128xi32>
    %27 = arith.sitofp %26 : vector<128x128xi32> to vector<128x128xf32>
    %cst_6 = arith.constant dense<0.000000e+00> : vector<8x128xf32>
    %28 = tpu.matmul %22, %27, %cst_6 {dimension_numbers = #tpu.dot_dimension_numbers<[1], [0], [0], [1], [0, 0, 1, 1], [], []>} : vector<8x128xf32>, vector<128x128xf32>, vector<8x128xf32> -> vector<8x128xf32>
    %cst_7 = arith.constant dense<0.000000e+00> : vector<8xf32>
    %29 = vector.multi_reduction <add>, %22, %cst_7 [1] : vector<8x128xf32> to vector<8xf32>
    %30 = vector.shape_cast %29 : vector<8xf32> to vector<8x1xf32>
    %31 = vector.shape_cast %30 : vector<8x1xf32> to vector<8x1xf32>
    %32 = vector.broadcast %31 : vector<8x1xf32> to vector<8x128xf32>
    %33 = tpu.iota {dimensions = array<i32: 0>} : vector<8x8xi32>
    %34 = tpu.iota {dimensions = array<i32: 1>} : vector<8x8xi32>
    %35 = arith.cmpi slt, %34, %33 : vector<8x8xi32>
    %36 = arith.extui %35 : vector<8x8xi1> to vector<8x8xi32>
    %37 = arith.sitofp %36 : vector<8x8xi32> to vector<8x8xf32>
    %cst_8 = arith.constant dense<0.000000e+00> : vector<8x128xf32>
    %38 = tpu.matmul %37, %32, %cst_8 {dimension_numbers = #tpu.dot_dimension_numbers<[1], [0], [0], [1], [0, 0, 1, 1], [], []>} : vector<8x8xf32>, vector<8x128xf32>, vector<8x128xf32> -> vector<8x128xf32>
    %39 = arith.addf %28, %38 : vector<8x128xf32>
    %cst_9 = arith.constant 9.99999974E-6 : f32
    %40 = vector.broadcast %cst_9 : f32 to vector<8x128xf32>
    %41 = arith.addf %39, %40 : vector<8x128xf32>
    %42 = math.log %41 : vector<8x128xf32>
    %43 = arith.subf %19, %42 : vector<8x128xf32>
    %cst_10 = arith.constant 0.000000e+00 : f32
    %44 = vector.broadcast %cst_10 : f32 to vector<8x128xf32>
    %45 = arith.subf %44, %43 : vector<8x128xf32>
    %46 = arith.mulf %45, %1 : vector<8x128xf32>
    %cst_11 = arith.constant 0.000000e+00 : f32
    %47 = vector.broadcast %cst_11 : f32 to vector<8x128xf32>
    %48 = arith.select %8, %46, %47 : vector<8x128xi1>, vector<8x128xf32>
    %49 = vector.shape_cast %48 : vector<8x128xf32> to vector<1x8x128xf32>
    %cst_12 = arith.constant dense<0.000000e+00> : vector<1xf32>
    %50 = vector.multi_reduction <add>, %49, %cst_12 [1, 2] : vector<1x8x128xf32> to vector<1xf32>
    %51 = vector.shape_cast %50 : vector<1xf32> to vector<1x1x1xf32>
    %52 = vector.extract %51[0, 0, 0] : f32 from vector<1x1x1xf32>
    %53 = vector.broadcast %52 : f32 to vector<1x1xf32>
    %cst_13 = arith.constant 1.250000e-01 : f32
    %54 = vector.broadcast %cst_13 : f32 to vector<1x1xf32>
    %55 = arith.mulf %53, %54 : vector<1x1xf32>
    %c0_14 = arith.constant 0 : index
    %c0_15 = arith.constant 0 : index
    %56 = vector.load %arg2[%c0_14, %c0_15] : memref<1x1xf32, #tpu.memory_space<vmem>>, vector<1x1xf32>
    tpu.vector_store %arg2[%c0_14, %c0_15], %55 {strides = array<i32>} : memref<1x1xf32, #tpu.memory_space<vmem>>, vector<1x1xf32>,
    return
  }
}

</mosaic_0001>

<bundles_post_ra>
// kernel: neg.1
= control target key start
LH: loop header
LB: loop body
LE: loop exit
PB: predicated region body
PF: predicated region fallthrough
CT: control target
= control target key end

     0   :  { %s24_s0 = inlined_call_operand.vmem [shape: f32[8], index: 0, kind: input, shape index: {}]   ;;  %s25_s1 = inlined_call_operand.vmem [shape: f32[8], index: 1, kind: output, shape index: {}]  }
   0x1   :  { %v2_v0 = vld [vmem:[%s24_s0] sm:$0x1] }
   0x2   :  { %v5_v1 = vxor.u32 2147483648, %v2_v0 }
   0x4   :  { %7 = vst [vmem:[%s25_s1] sm:$0x1] %v5_v1 }

// kernel: cox_loss_pallas.1
= control target key start
LH: loop header
LB: loop body
LE: loop exit
PB: predicated region body
PF: predicated region fallthrough
CT: control target
= control target key end

     0   :  { %v14_v0 = vlaneseq  ;;  %s533_s0 = inlined_call_operand.vmem [shape: f32[8,128], index: 0, kind: input, shape index: {}]   ;;  %s534_s1 = inlined_call_operand.vmem [shape: f32[8,128], index: 1, kind: input, shape index: {}]   ;;  %s535_s2 = inlined_call_operand.hbm [shape: f32[1,1], index: 2, kind: output, shape index: {}]  }
   0x1   :  { %7 = vsyncpa [#allocation3], 0  ;;  %v466_v4 = vld [vmem:[%s533_s0] sm:$0xff]  ;;  %v438_v8 = vmov 0.0|0.0   ;;  %v439_v13 = vmov 1.0|1.0  }
   0x2   :  { %v458_v1 = vshrl.u32 %v14_v0, 7  ;;  %v460_v2 = vand.u32 127, %v14_v0  ;;  %377 = vmatprep.subr.bf16.mxu1 %v438_v8  ;;  %v441_v24 = vmov 0.0   ;;  %v13_v49 = vld [vmem:[%s534_s1] sm:$0xff]  ;;  %s442_s13 = smov [#allocation2]  }
   0x3   :  { %337 = vmatprep.subr.mxu0 %v441_v24  ;;  %s275_s14 = sshll.u32 %s442_s13, 4  ;;  %s276_s14 = int_to_ptr.vmem [resolvable:$true] %s275_s14 }
   0x4   :  { %v18_v3 = vmul.u32 128, %v458_v1  ;;  %v37_v7 = vadd.s32 8, %v458_v1  ;;  %vm52_vm1 = vcmp.le.s32.totalorder %v458_v1, %v460_v2  ;;  %v38_v9 = vadd.s32 16, %v458_v1  ;;  %s414_s1 = scalar_lea.vmem %s276_s14, 16  ;;  %s418_s16 = scalar_lea.vmem %s276_s14, 32 }
   0x5   :  { %v39_v10 = vadd.s32 24, %v458_v1  ;;  %v40_v11 = vadd.s32 32, %v458_v1  ;;  %v41_v12 = vadd.s32 40, %v458_v1  ;;  %v42_v14 = vadd.s32 48, %v458_v1  ;;  %p415_p0 = scmp.ne.s32.totalorder %s276_s14, %s414_s1  ;;  %p419_p1 = scmp.lt.s32.totalorder %s276_s14, %s276_s14 }
   0x6   :  { %v469_v5 = vadd.s32 %v18_v3, %v460_v2  ;;  %vm53_vm2 = vcmp.le.s32.totalorder %v37_v7, %v460_v2  ;;  %vm54_vm4 = vcmp.le.s32.totalorder %v38_v9, %v460_v2  ;;  %v43_v15 = vadd.s32 56, %v458_v1  ;;  %p420_p2 = scmp.lt.s32.totalorder %s418_s16, %s414_s1 }
   0x7   :  { %vm378_vm3 = vmpackc.low %vm53_vm2, %vm52_vm1  ;;  %vm55_vm5 = vcmp.le.s32.totalorder %v39_v10, %v460_v2  ;;  %vm56_vm7 = vcmp.le.s32.totalorder %v40_v11, %v460_v2  ;;  %vm57_vm8 = vcmp.le.s32.totalorder %v41_v12, %v460_v2  ;;  %vm58_vm10 = vcmp.le.s32.totalorder %v42_v14, %v460_v2 }
   0x8   :  { %vm20_vm0 = vcmp.lt.s32.totalorder %v469_v5, 8  ;;  %379 = vmatpush3.bf16.msk.msra.mxu1 %vm378_vm3, %v439_v13  ;;  %vm381_vm6 = vmpackc.low %vm55_vm5, %vm54_vm4  ;;  %vm59_vm11 = vcmp.le.s32.totalorder %v43_v15, %v460_v2  ;;  %v44_v16 = vadd.s32 64, %v458_v1  ;;  %v45_v17 = vadd.s32 72, %v458_v1  ;;  %p421_p3 = por %p420_p2, %p419_p1 }
   0x9   :  { %v21_v6 = vsel %vm20_vm0, %v466_v4, -3.4e+38  ;;  %380 = vmatprep.subr.bf16.mxu1 %v438_v8  ;;  %vm384_vm9 = vmpackc.low %vm57_vm8, %vm56_vm7  ;;  %v46_v18 = vadd.s32 80, %v458_v1  ;;  %v47_v19 = vadd.s32 88, %v458_v1  ;;  %v48_v20 = vadd.s32 96, %v458_v1 }
   0xa   :  { %22 = vmax.xlane.f32.xlu0 %v21_v6  ;;  %vm387_vm12 = vmpackc.low %vm59_vm11, %vm58_vm10  ;;  %vm60_vm13 = vcmp.le.s32.totalorder %v44_v16, %v460_v2  ;;  %vm61_vm14 = vcmp.le.s32.totalorder %v45_v17, %v460_v2  ;;  %v49_v21 = vadd.s32 104, %v458_v1  ;;  %v50_v22 = vadd.s32 112, %v458_v1  ;;  %p422_p4 = pnand %p421_p3, %p415_p0 }
   0xb   :  { %vm390_vm15 = vmpackc.low %vm61_vm14, %vm60_vm13  ;;  %vm62_vm1 = vcmp.le.s32.totalorder %v46_v18, %v460_v2  ;;  %vm63_vm2 = vcmp.le.s32.totalorder %v47_v19, %v460_v2  ;;  %v51_v23 = vadd.s32 120, %v458_v1  ;;  %vm64_vm4 = vcmp.le.s32.totalorder %v48_v20, %v460_v2 }
   0xc   :  { %382 = vmatpush3.bf16.msk.msra.mxu1 %vm381_vm6, %v439_v13  ;;  %vm393_vm3 = vmpackc.low %vm63_vm2, %vm62_vm1  ;;  %vm65_vm5 = vcmp.le.s32.totalorder %v49_v21, %v460_v2  ;;  %vm66_vm6 = vcmp.le.s32.totalorder %v50_v22, %v460_v2  ;;  %vm440_vm8 = vmmov 0   ;;  %vm102_vm11 = vcmp.lt.s32.totalorder %v460_v2, %v458_v1 }
   0xd   :  { %383 = vmatprep.subr.bf16.mxu1 %v438_v8  ;;  %vm67_vm7 = vcmp.le.s32.totalorder %v51_v23, %v460_v2  ;;  %374 = vmatprep.mubr.msk.f32.mxu1 %vm440_vm8, %v441_v24  ;;  %v299_v38 = vsel %vm102_vm11, 1.0, %v441_v24  ;;  %vm267_vm13 = vcmask 0  }
   0xe   :  { %339 = vmatprep.mubr.msk.f32.mxu0 %vm440_vm8, %v441_v24  ;;  %vm399_vm10 = vmpackc.low %vm67_vm7, %vm66_vm6 }
  0x10   :  { %385 = vmatpush3.bf16.msk.msra.mxu1 %vm384_vm9, %v439_v13  ;;  %vm396_vm9 = vmpackc.low %vm65_vm5, %vm64_vm4 }
  0x11   :  { %386 = vmatprep.subr.bf16.mxu1 %v438_v8 }
  0x14   :  { %388 = vmatpush3.bf16.msk.msra.mxu1 %vm387_vm12, %v439_v13  ;;  %vm105_vm12 = vcmask 64512  }
  0x15   :  { %389 = vmatprep.subr.bf16.mxu1 %v438_v8 }
  0x18   :  { %391 = vmatpush3.bf16.msk.msra.mxu1 %vm390_vm15, %v439_v13 }
  0x19   :  { %392 = vmatprep.subr.bf16.mxu1 %v438_v8 }
  0x1c   :  { %394 = vmatpush3.bf16.msk.msra.mxu1 %vm393_vm3, %v439_v13 }
  0x1d   :  { %395 = vmatprep.subr.bf16.mxu1 %v438_v8 }
  0x20   :  { %397 = vmatpush3.bf16.msk.msra.mxu1 %vm396_vm9, %v439_v13 }
  0x21   :  { %398 = vmatprep.subr.bf16.mxu1 %v438_v8 }
  0x24   :  { %400 = vmatpush3.bf16.msk.msra.mxu1 %vm399_vm10, %v439_v13 }
  0x97   :  { %v23_v25 = vpop.xlane.xlu0 %22 }
  0x98   :  { %v24_v26 = vrot.slane %v23_v25, 4 }
  0x9a   :  { %v25_v27 = vmax.f32 %v23_v25, %v24_v26 }
  0x9c   :  { %v26_v28 = vrot.slane %v25_v27, 2 }
  0x9e   :  { %v27_v29 = vmax.f32 %v25_v27, %v26_v28 }
  0xa0   :  { %v28_v30 = vrot.slane %v27_v29, 1 }
  0xa2   :  { %v29_v31 = vmax.f32 %v27_v29, %v28_v30 }
  0xa4   :  { %401 = vpush %v29_v31 }
  0xd5   :  { %s402_s0 = spop %401 }
  0xd6   :  { %v31_v32 = vstv %s402_s0 }
  0xd7   :  { %v32_v33 = vsub.f32 %v466_v4, %v31_v32 }
  0xd9   :  { %v33_v34 = vsel %vm20_vm0, %v32_v33, 0.0 }
  0xda   :  { %v34_v35 = vmul.f32 1.442695, %v33_v34 }
  0xdc   :  { %410 = vpow2.f32 %v34_v35 }
  0xe6   :  { %v411_v36 = vpop.eup %410 }
  0xe7   :  { %375 = vmatmul.mubr.msk.f32.vlgmr.msra.gmra.mrb[0].mxu1 %vm20_vm0, %v411_v36  ;;  %v36_v37 = vsel %vm20_vm0, %v411_v36, 0.0 }
  0xe8   :  { %100 = vadd.xlane.f32.xlu0 %v36_v37 }
 0x175   :  { %v101_v39 = vpop.xlane.xlu0 %100 }
 0x176   :  { %338 = vmatpush3.msra.mxu0 %v101_v39 }
 0x177   :  { %340 = vmatmul.mubr.msk.f32.vlgmr.msra.gmra.mrb[0].mxu0 %vm105_vm12, %v299_v38 }
 0x1ba   :  { %v245_v40 = vpop.f32.mrb[0].mxu1 }
 0x1bb   :  { %v376_v41 = vpop.f32.mrb[1].mxu1 }
 0x24a   :  { %v175_v42 = vpop.f32.mrb[0].mxu0 }
 0x24b   :  { %v246_v43 = vadd.f32 %v245_v40, %v175_v42  ;;  %v341_v44 = vpop.f32.mrb[1].mxu0 }
 0x24d   :  { %v249_v45 = vadd.f32 1e-05, %v246_v43 }
 0x24f   :  { %412 = vlog2.f32 %v249_v45 }
 0x259   :  { %v413_v46 = vpop.eup %412 }
 0x25a   :  { %v251_v47 = vmul.f32 0.6931472, %v413_v46 }
 0x25c   :  { %v252_v48 = vsub.f32 %v33_v34, %v251_v47 }
 0x25e   :  { %v253_v50 = vsub.f32 0.0, %v252_v48 }
 0x260   :  { %v254_v51 = vmul.f32 %v253_v50, %v13_v49 }
 0x262   :  { %v255_v52 = vsel %vm20_vm0, %v254_v51, 0.0 }
 0x263   :  { %256 = vadd.xlane.f32.xlu1 %v255_v52 }
 0x2f0   :  { %v257_v53 = vpop.xlane.xlu1 %256 }
 0x2f1   :  { %v258_v54 = vrot.slane %v257_v53, 4 }
 0x2f3   :  { %v259_v55 = vadd.f32 %v258_v54, %v257_v53 }
 0x2f5   :  { %v260_v56 = vrot.slane %v259_v55, 2 }
 0x2f7   :  { %v261_v57 = vadd.f32 %v260_v56, %v259_v55 }
 0x2f9   :  { %v262_v58 = vrot.slane %v261_v57, 1 }
 0x2fb   :  { %v263_v59 = vadd.f32 %v262_v58, %v261_v57 }
 0x2fd   :  { %403 = vpush %v263_v59 }
 0x32e   :  { %s404_s15 = spop %403 }
 0x32f   :  { %v265_v60 = vstv %s404_s15 }
 0x330   :  { %v266_v61 = vmul.f32 0.125, %v265_v60 }
 0x332   :  { %268 = vst.msk [vmem:[#allocation2] sm:$0x1] %vm267_vm13, %v266_v61 }
 0x333   :  { %425 = shalt.err (!%p422_p4)
}
 0x334   :  { %s426_s19 = scalar_lea.hbm %s535_s2, 16 }
 0x335   :  { %p427_p5 = scmp.ne.s32.totalorder %s535_s2, %s426_s19  ;;  %p430_p6 = scmp.lt.u32.totalorder %s426_s19, %s535_s2 }
 0x337   :  { %p432_p7 = pnand %p430_p6, %p427_p5 }
 0x339   :  { %435 = shalt.err (!%p432_p7)
}
 0x33a   :  { %278 = dma.vmem_to_hbm [thread:$0]  %s276_s14, 16, %s535_s2, [#allocation3]  }
 0x33b   :  { %436 = dma.done.wait [#allocation3], 16  }
 0x33c   :  { %437 = vsyncadd [#allocation3], 4294967280 }
 0x33d   :  { %282 = vsyncpa [#allocation3], 1 }

</bundles_post_ra>
